<compile_context>
chip_gen: v6e
topology: v6e:2x2x1
jax: 0.10.0
libtpu: 0.0.40
codegen_flags: <defaults>
</compile_context>

<pallas_src>
import jax
import jax.numpy as jnp
from jax import lax
from jax.experimental import pallas as pl
from jax.experimental.pallas import tpu as pltpu

EPS = 1e-12          # matches torch.nn.functional.normalize default eps
LANE = 128
CPAD = 128           # padded lane width for class-rep / logit dims
TN_MAX = 1024        # query-row tile upper bound
TD_MAX = 1024        # exemplar tile upper bound (trailing "arbitrary" axis)
VMEM_BUDGET = 40 * 1024 * 1024   # conservative per-step budget (fits v7x 64 MiB physical)
VMEM_LIMIT = 48 * 1024 * 1024    # scoped VMEM limit (<= ~48 MiB for v7x headroom)


def _round_up(x, m):
    return ((x + m - 1) // m) * m


def _cdiv(a, b):
    return -(-a // b)


def _l2_normalize(x, axis=-1):
    # torch.nn.functional.normalize: x / max(||x||, eps) == x * rsqrt(max(sumsq, eps^2))
    ssq = jnp.sum(x * x, axis=axis, keepdims=True)
    return x * lax.rsqrt(jnp.maximum(ssq, EPS * EPS))


def _signed_power(s, p):
    """sign(s) * |s|**p with an f32 VPU repeated-multiply fast path for small integer p."""
    pf = float(p)
    if pf == int(pf) and 1 <= int(pf) <= 8:
        pi = int(pf)
        if pi == 1:
            return s
        if pi % 2 == 1:            # odd p: sign(s)*|s|^p == s^p
            out = s
            for _ in range(pi - 1):
                out = out * s
            return out
        a = jnp.abs(s)             # even p: need explicit sign
        out = a
        for _ in range(pi - 1):
            out = out * a
        return jnp.sign(s) * out
    # general (non-integer) p: EUP exp/log path, guarded at |s| == 0
    a = jnp.abs(s)
    pw = jnp.exp(pf * jnp.log(jnp.maximum(a, 1e-30)))
    pw = jnp.where(a == 0.0, 0.0, pw)
    return jnp.sign(s) * pw


def _make_kernel(p_factor, store_activations):
    def kernel(feat_ref, w_ref, b_ref, efnT_ref, excls_ref, crT_ref,
               mult_ref, thresh_ref, *refs):
        if store_activations:
            echo_ref, logits_ref, a_ref, fn_sc, echo_sc = refs
        else:
            echo_ref, logits_ref, fn_sc, echo_sc = refs
            a_ref = None

        d = pl.program_id(1)
        nd = pl.num_programs(1)

        # --- per-query-tile setup: g() projection + L2 normalize (once per N tile) ---
        @pl.when(d == 0)
        def _():
            f = jnp.dot(feat_ref[...], w_ref[...],
                        preferred_element_type=jnp.float32) + b_ref[...]      # (TN, F_pad)
            ssq = jnp.sum(f * f, axis=-1, keepdims=True)
            fn = f * lax.rsqrt(jnp.maximum(ssq, EPS * EPS))
            fn_sc[...] = fn.astype(fn_sc.dtype)
            echo_sc[...] = jnp.zeros_like(echo_sc)

        # --- similarity: (TN, F_pad) x (F_pad, TD) low-precision MXU matmul, f32 acc ---
        s = jnp.dot(fn_sc[...], efnT_ref[...],
                    preferred_element_type=jnp.float32)                       # (TN, TD)

        # --- activation: sign(s) * |s|^p, computed in f32 on the VPU ---
        a = _signed_power(s, p_factor)
        a_lo = a.astype(excls_ref.dtype)          # single cast, reused for store + dot

        if store_activations:
            a_ref[...] = a_lo if a_ref.dtype == a_lo.dtype else a.astype(a_ref.dtype)

        # --- echo accumulation: (TN, TD) x (TD, CPAD), bf16 operands, f32 accumulator ---
        echo_sc[...] += jnp.dot(a_lo, excls_ref[...],
                                preferred_element_type=jnp.float32)

        # --- finalize on the last exemplar tile ---
        @pl.when(d == nd - 1)
        def _():
            echo = echo_sc[...]
            ssq = jnp.sum(echo * echo, axis=-1, keepdims=True)
            echo_n = echo * lax.rsqrt(jnp.maximum(ssq, EPS * EPS))
            logits = jnp.dot(echo_n, crT_ref[...], preferred_element_type=jnp.float32)
            logits_ref[...] = logits * mult_ref[...] - thresh_ref[...]
            echo_ref[...] = echo

    return kernel


def _vmem_bytes(TN, TD, IN_pad, F_pad, sim_bytes, act_bytes, store_acts):
    """Rough per-step VMEM footprint incl. double buffers."""
    est = 0
    est += 2 * TN * IN_pad * 4               # features tile
    est += 2 * IN_pad * F_pad * 4            # W (resident)
    est += 2 * F_pad * 4                     # b
    est += 2 * F_pad * TD * sim_bytes        # efnT tile
    est += 2 * TD * CPAD * sim_bytes         # excls tile
    est += 2 * CPAD * CPAD * 4               # crT
    est += 4 * CPAD * 4                      # mult + thresh
    est += 2 * TN * CPAD * 4 * 2             # echo + logits out tiles
    if store_acts:
        est += 2 * TN * TD * act_bytes       # activations out tile
    est += TN * F_pad * sim_bytes            # fn_sc scratch
    est += TN * CPAD * 4                     # echo_sc scratch
    return est


def minerva_ffnn2_forward(features, ex_features, ex_classes,
                          W, b, class_reps, mult, thresh, p_factor=1.0,
                          sim_dtype=jnp.bfloat16,
                          activations_dtype=jnp.bfloat16,
                          return_activations=True):
    """Pure-JAX wrapper reproducing minerva_ffnn2.forward (labels=None, eval mode).

    sim_dtype controls the MXU operand precision of BOTH the similarity matmul
    and the echo-accumulation matmul (accumulation is always f32); pass
    jnp.float32 for a bit-faithful f32 path.  activations_dtype=bfloat16 halves
    the dominant HBM writeback; set return_activations=False to skip it.
    """
    features = features.astype(jnp.float32)
    ex_features = ex_features.astype(jnp.float32)
    W = W.astype(jnp.float32)
    b = b.astype(jnp.float32)
    class_reps = class_reps.astype(jnp.float32)

    N, IN = features.shape
    D = ex_features.shape[0]
    C = class_reps.shape[0]
    F = W.shape[1]

    # --- parameter setup + exemplar-side precompute (hoisted out of the kernel) ---
    ex_class_reps = _l2_normalize(ex_classes.astype(jnp.float32)) @ class_reps   # (D, 2)
    ef = ex_features @ W + b[None, :]                                            # (D, F)
    efn = _l2_normalize(ef)                                                      # (D, F)
    crn = _l2_normalize(class_reps)                                              # (C, 2)

    # --- tile selection ---
    IN_pad = _round_up(IN, LANE)
    F_pad = _round_up(F, LANE)

    TN = min(TN_MAX, _round_up(N, 16))
    if N > 16:
        # keep >= 2 N tiles when possible so both v7x TensorCores get work
        TN = min(TN, _round_up(_cdiv(N, 2), 16))
    TD = min(TD_MAX, _round_up(D, LANE))

    sim_bytes = jnp.dtype(sim_dtype).itemsize
    act_bytes = jnp.dtype(activations_dtype).itemsize
    while _vmem_bytes(TN, TD, IN_pad, F_pad, sim_bytes, act_bytes,
                      return_activations) > VMEM_BUDGET:
        if TD > 256:
            TD //= 2
        elif TN > 32:
            TN = max(16, _round_up(TN // 2, 16))
        else:
            break

    N_pad = _round_up(N, TN)
    D_pad = _round_up(D, TD)

    # --- zero-padding to lane/sublane-friendly shapes (numerically exact) ---
    feat_p = jnp.zeros((N_pad, IN_pad), jnp.float32).at[:N, :IN].set(features)
    W_p = jnp.zeros((IN_pad, F_pad), jnp.float32).at[:IN, :F].set(W)
    b_p = jnp.zeros((1, F_pad), jnp.float32).at[0, :F].set(b)
    efnT_p = jnp.zeros((F_pad, D_pad), sim_dtype).at[:F, :D].set(efn.T.astype(sim_dtype))
    excls_p = jnp.zeros((D_pad, CPAD), sim_dtype).at[:D, :2].set(
        ex_class_reps.astype(sim_dtype))
    crT_p = jnp.zeros((CPAD, CPAD), jnp.float32).at[:2, :C].set(crn.T)
    mult_p = jnp.zeros((1, CPAD), jnp.float32).at[0, :C].set(mult.astype(jnp.float32))
    thresh_p = jnp.zeros((1, CPAD), jnp.float32).at[0, :C].set(thresh.astype(jnp.float32))

    grid = (N_pad // TN, D_pad // TD)
    n_i = grid[0]

    flops = 2 * N_pad * (IN_pad * F_pad + D_pad * F_pad + D_pad * CPAD + CPAD * CPAD)
    bytes_accessed = (
        feat_p.size * 4
        + (W_p.size + b_p.size + crT_p.size + mult_p.size + thresh_p.size) * 4
        + n_i * (efnT_p.size + excls_p.size) * sim_bytes
        + N_pad * CPAD * 4 * 2
    )
    if return_activations:
        bytes_accessed += N_pad * D_pad * act_bytes

    out_shapes = [
        jax.ShapeDtypeStruct((N_pad, CPAD), jnp.float32),            # echo (lane-padded)
        jax.ShapeDtypeStruct((N_pad, CPAD), jnp.float32),            # logits (lane-padded)
    ]
    out_specs = [
        pl.BlockSpec((TN, CPAD), lambda i, d: (i, 0)),
        pl.BlockSpec((TN, CPAD), lambda i, d: (i, 0)),
    ]
    if return_activations:
        out_shapes.append(jax.ShapeDtypeStruct((N_pad, D_pad), activations_dtype))
        out_specs.append(pl.BlockSpec((TN, TD), lambda i, d: (i, d)))

    kernel = _make_kernel(float(p_factor), return_activations)
    outs = pl.pallas_call(
        kernel,
        out_shape=tuple(out_shapes),
        grid_spec=pltpu.PrefetchScalarGridSpec(
            num_scalar_prefetch=0,
            grid=grid,
            in_specs=[
                pl.BlockSpec((TN, IN_pad), lambda i, d: (i, 0)),      # features
                pl.BlockSpec((IN_pad, F_pad), lambda i, d: (0, 0)),   # W (resident)
                pl.BlockSpec((1, F_pad), lambda i, d: (0, 0)),        # b (resident)
                pl.BlockSpec((F_pad, TD), lambda i, d: (0, d)),       # efn^T, tiled over D
                pl.BlockSpec((TD, CPAD), lambda i, d: (d, 0)),        # ex_class_reps, tiled over D
                pl.BlockSpec((CPAD, CPAD), lambda i, d: (0, 0)),      # class_reps^T (resident)
                pl.BlockSpec((1, CPAD), lambda i, d: (0, 0)),         # mult
                pl.BlockSpec((1, CPAD), lambda i, d: (0, 0)),         # thresh
            ],
            out_specs=out_specs,
            scratch_shapes=[
                pltpu.VMEM((TN, F_pad), sim_dtype),                   # cached normalized query proj
                pltpu.VMEM((TN, CPAD), jnp.float32),                  # echo f32 accumulator
            ],
        ),
        compiler_params=pltpu.CompilerParams(
            dimension_semantics=("parallel", "arbitrary"),
            vmem_limit_bytes=VMEM_LIMIT,
        ),
        cost_estimate=pl.CostEstimate(flops=int(flops),
                                      transcendentals=int(2 * N_pad),
                                      bytes_accessed=int(bytes_accessed)),
    )(feat_p, W_p, b_p, efnT_p, excls_p, crT_p, mult_p, thresh_p)

    if return_activations:
        echo_o, logits_o, a_o = outs
        a = a_o[:N, :D].astype(jnp.float32)
    else:
        echo_o, logits_o = outs
        a = None

    echo = echo_o[:N, :2]
    logits = logits_o[:N, :C]
    return {'echo': echo, 'loss': None, 'logits': logits, 'activations': a}


if __name__ == "__main__":
    key = jax.random.PRNGKey(0)
    N, D, IN_DIM, FEAT_DIM, C = 8, 16, 32, 16, 4
    k1, k2, k3, k4, k5 = jax.random.split(key, 5)

    # Example inputs.
    features = jax.random.normal(k1, (N, IN_DIM), jnp.float32)
    ex_features = jax.random.normal(k2, (D, IN_DIM), jnp.float32)
    ex_classes = jax.random.bernoulli(k3, 0.5, (D, C)).astype(jnp.float32)

    # Deterministic parameter init (mirrors module __init__ shapes).
    bound = 1.0 / (IN_DIM ** 0.5)
    W = jax.random.uniform(k4, (IN_DIM, FEAT_DIM), jnp.float32, -bound, bound)  # g.Linear weight^T
    b = jax.random.uniform(k5, (FEAT_DIM,), jnp.float32, -bound, bound)         # g.Linear bias
    class_reps = jnp.array([[0, 1], [-1, 0], [0, -1], [1, 0]], jnp.float32)
    mult = jnp.ones((C,), jnp.float32)      # args.use_mult -> init to ones
    thresh = jnp.zeros((C,), jnp.float32)   # args.use_thresh -> init to zeros

    out = minerva_ffnn2_forward(features, ex_features, ex_classes,
                                W, b, class_reps, mult, thresh, p_factor=3.0)
    jax.block_until_ready(out['logits'])
    jax.block_until_ready(out['echo'])
    jax.block_until_ready(out['activations'])
    assert out['echo'].shape == (N, 2)
    assert out['logits'].shape == (N, C)
    assert out['activations'].shape == (N, D)

    # Also exercise the logits-only path (activations stream dropped).
    out2 = minerva_ffnn2_forward(features, ex_features, ex_classes,
                                 W, b, class_reps, mult, thresh, p_factor=3.0,
                                 return_activations=False)
    jax.block_until_ready(out2['logits'])
    assert out2['logits'].shape == (N, C)
    print("KERNEL_OK")
</pallas_src>

<mosaic_0001>
module attributes {stable_mosaic.version = 11 : i64} {
  func.func @kernel(%arg0: i32, %arg1: i32, %arg2: memref<16x128xf32, #tpu.memory_space<vmem>>, %arg3: memref<128x128xf32, #tpu.memory_space<vmem>>, %arg4: memref<1x128xf32, #tpu.memory_space<vmem>>, %arg5: memref<128x128xbf16, #tpu.memory_space<vmem>>, %arg6: memref<128x128xbf16, #tpu.memory_space<vmem>>, %arg7: memref<128x128xf32, #tpu.memory_space<vmem>>, %arg8: memref<1x128xf32, #tpu.memory_space<vmem>>, %arg9: memref<1x128xf32, #tpu.memory_space<vmem>>, %arg10: memref<16x128xf32, #tpu.memory_space<vmem>>, %arg11: memref<16x128xf32, #tpu.memory_space<vmem>>, %arg12: memref<16x128xbf16, #tpu.memory_space<vmem>>, %arg13: memref<16x128xbf16, #tpu.memory_space<vmem>>, %arg14: memref<16x128xf32, #tpu.memory_space<vmem>>) attributes {dimension_semantics = [#tpu.dimension_semantics<parallel>, #tpu.dimension_semantics<arbitrary>], iteration_bounds = array<i64: 1, 1>, scalar_prefetch = 0 : i64, scratch_operands = 2 : i64, tpu.core_type = #tpu.core_type<tc>, window_params = [{transform_indices = @transform_0, window_bounds = array<i64: 16, 128>}, {pipeline_mode = #tpu.pipeline_mode<synchronous>, transform_indices = @transform_1, window_bounds = array<i64: 128, 128>}, {pipeline_mode = #tpu.pipeline_mode<synchronous>, transform_indices = @transform_2, window_bounds = array<i64: 1, 128>}, {transform_indices = @transform_3, window_bounds = array<i64: 128, 128>}, {transform_indices = @transform_4, window_bounds = array<i64: 128, 128>}, {pipeline_mode = #tpu.pipeline_mode<synchronous>, transform_indices = @transform_5, window_bounds = array<i64: 128, 128>}, {pipeline_mode = #tpu.pipeline_mode<synchronous>, transform_indices = @transform_6, window_bounds = array<i64: 1, 128>}, {pipeline_mode = #tpu.pipeline_mode<synchronous>, transform_indices = @transform_7, window_bounds = array<i64: 1, 128>}, {transform_indices = @transform_8, window_bounds = array<i64: 16, 128>}, {transform_indices = @transform_9, window_bounds = array<i64: 16, 128>}, {transform_indices = @transform_10, window_bounds = array<i64: 16, 128>}]} {
    %c0_i32 = arith.constant 0 : i32
    %0 = arith.cmpi eq, %arg1, %c0_i32 : i32
    %1 = arith.extui %0 : i1 to i32
    %c0_i32_0 = arith.constant 0 : i32
    %2 = arith.cmpi ne, %1, %c0_i32_0 : i32
    scf.if %2 {
      %c0_15 = arith.constant 0 : index
      %c0_16 = arith.constant 0 : index
      %18 = vector.load %arg2[%c0_15, %c0_16] : memref<16x128xf32, #tpu.memory_space<vmem>>, vector<16x128xf32>
      %c0_17 = arith.constant 0 : index
      %c0_18 = arith.constant 0 : index
      %19 = vector.load %arg3[%c0_17, %c0_18] : memref<128x128xf32, #tpu.memory_space<vmem>>, vector<128x128xf32>
      %cst_19 = arith.constant dense<0.000000e+00> : vector<16x128xf32>
      %20 = tpu.matmul %18, %19, %cst_19 {dimension_numbers = #tpu.dot_dimension_numbers<[1], [0], [0], [1], [0, 0, 1, 1], [], []>} : vector<16x128xf32>, vector<128x128xf32>, vector<16x128xf32> -> vector<16x128xf32>
      %c0_20 = arith.constant 0 : index
      %c0_21 = arith.constant 0 : index
      %21 = vector.load %arg4[%c0_20, %c0_21] : memref<1x128xf32, #tpu.memory_space<vmem>>, vector<1x128xf32>
      %22 = vector.broadcast %21 : vector<1x128xf32> to vector<16x128xf32>
      %23 = arith.addf %20, %22 : vector<16x128xf32>
      %24 = arith.mulf %23, %23 : vector<16x128xf32>
      %cst_22 = arith.constant dense<0.000000e+00> : vector<16xf32>
      %25 = vector.multi_reduction <add>, %24, %cst_22 [1] : vector<16x128xf32> to vector<16xf32>
      %26 = vector.shape_cast %25 : vector<16xf32> to vector<16x1xf32>
      %cst_23 = arith.constant 1.000000e-24 : f32
      %27 = vector.broadcast %cst_23 : f32 to vector<16x1xf32>
      %28 = arith.maximumf %26, %27 : vector<16x1xf32>
      %29 = math.rsqrt %28 : vector<16x1xf32>
      %30 = vector.broadcast %29 : vector<16x1xf32> to vector<16x128xf32>
      %31 = arith.mulf %23, %30 : vector<16x128xf32>
      %32 = arith.truncf %31 : vector<16x128xf32> to vector<16x128xbf16>
      %c0_24 = arith.constant 0 : index
      %c0_25 = arith.constant 0 : index
      %33 = vector.load %arg13[%c0_24, %c0_25] : memref<16x128xbf16, #tpu.memory_space<vmem>>, vector<16x128xbf16>
      tpu.vector_store %arg13[%c0_24, %c0_25], %32 {strides = array<i32>} : memref<16x128xbf16, #tpu.memory_space<vmem>>, vector<16x128xbf16>,
      %cst_26 = arith.constant 0.000000e+00 : f32
      %34 = vector.broadcast %cst_26 : f32 to vector<16x128xf32>
      %c0_27 = arith.constant 0 : index
      %c0_28 = arith.constant 0 : index
      %35 = vector.load %arg14[%c0_27, %c0_28] : memref<16x128xf32, #tpu.memory_space<vmem>>, vector<16x128xf32>
      tpu.vector_store %arg14[%c0_27, %c0_28], %34 {strides = array<i32>} : memref<16x128xf32, #tpu.memory_space<vmem>>, vector<16x128xf32>,
    } else {
    }
    %c0 = arith.constant 0 : index
    %c0_1 = arith.constant 0 : index
    %3 = vector.load %arg13[%c0, %c0_1] : memref<16x128xbf16, #tpu.memory_space<vmem>>, vector<16x128xbf16>
    %c0_2 = arith.constant 0 : index
    %c0_3 = arith.constant 0 : index
    %4 = vector.load %arg5[%c0_2, %c0_3] : memref<128x128xbf16, #tpu.memory_space<vmem>>, vector<128x128xbf16>
    %cst = arith.constant dense<0.000000e+00> : vector<16x128xf32>
    %5 = tpu.matmul %3, %4, %cst {dimension_numbers = #tpu.dot_dimension_numbers<[1], [0], [0], [1], [0, 0, 1, 1], [], []>} : vector<16x128xbf16>, vector<128x128xbf16>, vector<16x128xf32> -> vector<16x128xf32>
    %6 = arith.mulf %5, %5 : vector<16x128xf32>
    %7 = arith.mulf %6, %5 : vector<16x128xf32>
    %8 = arith.truncf %7 : vector<16x128xf32> to vector<16x128xbf16>
    %c0_4 = arith.constant 0 : index
    %c0_5 = arith.constant 0 : index
    %9 = vector.load %arg12[%c0_4, %c0_5] : memref<16x128xbf16, #tpu.memory_space<vmem>>, vector<16x128xbf16>
    tpu.vector_store %arg12[%c0_4, %c0_5], %8 {strides = array<i32>} : memref<16x128xbf16, #tpu.memory_space<vmem>>, vector<16x128xbf16>,
    %c0_6 = arith.constant 0 : index
    %c0_7 = arith.constant 0 : index
    %10 = vector.load %arg14[%c0_6, %c0_7] : memref<16x128xf32, #tpu.memory_space<vmem>>, vector<16x128xf32>
    %c0_8 = arith.constant 0 : index
    %c0_9 = arith.constant 0 : index
    %11 = vector.load %arg6[%c0_8, %c0_9] : memref<128x128xbf16, #tpu.memory_space<vmem>>, vector<128x128xbf16>
    %cst_10 = arith.constant dense<0.000000e+00> : vector<16x128xf32>
    %12 = tpu.matmul %8, %11, %cst_10 {dimension_numbers = #tpu.dot_dimension_numbers<[1], [0], [0], [1], [0, 0, 1, 1], [], []>} : vector<16x128xbf16>, vector<128x128xbf16>, vector<16x128xf32> -> vector<16x128xf32>
    %13 = arith.addf %10, %12 : vector<16x128xf32>
    %c0_11 = arith.constant 0 : index
    %c0_12 = arith.constant 0 : index
    %14 = vector.load %arg14[%c0_11, %c0_12] : memref<16x128xf32, #tpu.memory_space<vmem>>, vector<16x128xf32>
    tpu.vector_store %arg14[%c0_11, %c0_12], %13 {strides = array<i32>} : memref<16x128xf32, #tpu.memory_space<vmem>>, vector<16x128xf32>,
    %c0_i32_13 = arith.constant 0 : i32
    %15 = arith.cmpi eq, %arg1, %c0_i32_13 : i32
    %16 = arith.extui %15 : i1 to i32
    %c0_i32_14 = arith.constant 0 : i32
    %17 = arith.cmpi ne, %16, %c0_i32_14 : i32
    scf.if %17 {
      %c0_15 = arith.constant 0 : index
      %c0_16 = arith.constant 0 : index
      %18 = vector.load %arg14[%c0_15, %c0_16] : memref<16x128xf32, #tpu.memory_space<vmem>>, vector<16x128xf32>
      %19 = arith.mulf %18, %18 : vector<16x128xf32>
      %cst_17 = arith.constant dense<0.000000e+00> : vector<16xf32>
      %20 = vector.multi_reduction <add>, %19, %cst_17 [1] : vector<16x128xf32> to vector<16xf32>
      %21 = vector.shape_cast %20 : vector<16xf32> to vector<16x1xf32>
      %cst_18 = arith.constant 1.000000e-24 : f32
      %22 = vector.broadcast %cst_18 : f32 to vector<16x1xf32>
      %23 = arith.maximumf %21, %22 : vector<16x1xf32>
      %24 = math.rsqrt %23 : vector<16x1xf32>
      %25 = vector.broadcast %24 : vector<16x1xf32> to vector<16x128xf32>
      %26 = arith.mulf %18, %25 : vector<16x128xf32>
      %c0_19 = arith.constant 0 : index
      %c0_20 = arith.constant 0 : index
      %27 = vector.load %arg7[%c0_19, %c0_20] : memref<128x128xf32, #tpu.memory_space<vmem>>, vector<128x128xf32>
      %cst_21 = arith.constant dense<0.000000e+00> : vector<16x128xf32>
      %28 = tpu.matmul %26, %27, %cst_21 {dimension_numbers = #tpu.dot_dimension_numbers<[1], [0], [0], [1], [0, 0, 1, 1], [], []>} : vector<16x128xf32>, vector<128x128xf32>, vector<16x128xf32> -> vector<16x128xf32>
      %c0_22 = arith.constant 0 : index
      %c0_23 = arith.constant 0 : index
      %29 = vector.load %arg8[%c0_22, %c0_23] : memref<1x128xf32, #tpu.memory_space<vmem>>, vector<1x128xf32>
      %30 = vector.broadcast %29 : vector<1x128xf32> to vector<16x128xf32>
      %31 = arith.mulf %28, %30 : vector<16x128xf32>
      %c0_24 = arith.constant 0 : index
      %c0_25 = arith.constant 0 : index
      %32 = vector.load %arg9[%c0_24, %c0_25] : memref<1x128xf32, #tpu.memory_space<vmem>>, vector<1x128xf32>
      %33 = vector.broadcast %32 : vector<1x128xf32> to vector<16x128xf32>
      %34 = arith.subf %31, %33 : vector<16x128xf32>
      %c0_26 = arith.constant 0 : index
      %c0_27 = arith.constant 0 : index
      %35 = vector.load %arg11[%c0_26, %c0_27] : memref<16x128xf32, #tpu.memory_space<vmem>>, vector<16x128xf32>
      tpu.vector_store %arg11[%c0_26, %c0_27], %34 {strides = array<i32>} : memref<16x128xf32, #tpu.memory_space<vmem>>, vector<16x128xf32>,
      %c0_28 = arith.constant 0 : index
      %c0_29 = arith.constant 0 : index
      %36 = vector.load %arg10[%c0_28, %c0_29] : memref<16x128xf32, #tpu.memory_space<vmem>>, vector<16x128xf32>
      tpu.vector_store %arg10[%c0_28, %c0_29], %18 {strides = array<i32>} : memref<16x128xf32, #tpu.memory_space<vmem>>, vector<16x128xf32>,
    } else {
    }
    return
  }
  func.func @transform_0(%arg0: i32, %arg1: i32) -> (i32, i32) {
    %c0_i32 = arith.constant 0 : i32
    %c0_i32_0 = arith.constant 0 : i32
    return %arg0, %c0_i32 : i32, i32
  }
  func.func @transform_1(%arg0: i32, %arg1: i32) -> (i32, i32) {
    %c0_i32 = arith.constant 0 : i32
    %c0_i32_0 = arith.constant 0 : i32
    %c0_i32_1 = arith.constant 0 : i32
    return %c0_i32, %c0_i32_0 : i32, i32
  }
  func.func @transform_2(%arg0: i32, %arg1: i32) -> (i32, i32) {
    %c0_i32 = arith.constant 0 : i32
    %c0_i32_0 = arith.constant 0 : i32
    %c0_i32_1 = arith.constant 0 : i32
    return %c0_i32, %c0_i32_0 : i32, i32
  }
  func.func @transform_3(%arg0: i32, %arg1: i32) -> (i32, i32) {
    %c0_i32 = arith.constant 0 : i32
    %c0_i32_0 = arith.constant 0 : i32
    return %c0_i32, %arg1 : i32, i32
  }
  func.func @transform_4(%arg0: i32, %arg1: i32) -> (i32, i32) {
    %c0_i32 = arith.constant 0 : i32
    %c0_i32_0 = arith.constant 0 : i32
    return %arg1, %c0_i32 : i32, i32
  }
  func.func @transform_5(%arg0: i32, %arg1: i32) -> (i32, i32) {
    %c0_i32 = arith.constant 0 : i32
    %c0_i32_0 = arith.constant 0 : i32
    %c0_i32_1 = arith.constant 0 : i32
    return %c0_i32, %c0_i32_0 : i32, i32
  }
  func.func @transform_6(%arg0: i32, %arg1: i32) -> (i32, i32) {
    %c0_i32 = arith.constant 0 : i32
    %c0_i32_0 = arith.constant 0 : i32
    %c0_i32_1 = arith.constant 0 : i32
    return %c0_i32, %c0_i32_0 : i32, i32
  }
  func.func @transform_7(%arg0: i32, %arg1: i32) -> (i32, i32) {
    %c0_i32 = arith.constant 0 : i32
    %c0_i32_0 = arith.constant 0 : i32
    %c0_i32_1 = arith.constant 0 : i32
    return %c0_i32, %c0_i32_0 : i32, i32
  }
  func.func @transform_8(%arg0: i32, %arg1: i32) -> (i32, i32) {
    %c0_i32 = arith.constant 0 : i32
    %c0_i32_0 = arith.constant 0 : i32
    return %arg0, %c0_i32 : i32, i32
  }
  func.func @transform_9(%arg0: i32, %arg1: i32) -> (i32, i32) {
    %c0_i32 = arith.constant 0 : i32
    %c0_i32_0 = arith.constant 0 : i32
    return %arg0, %c0_i32 : i32, i32
  }
  func.func @transform_10(%arg0: i32, %arg1: i32) -> (i32, i32) {
    %c0_i32 = arith.constant 0 : i32
    return %arg0, %arg1 : i32, i32
  }
}

</mosaic_0001>

<bundles_post_ra>
// kernel: tpu_custom_call.1
= control target key start
LH: loop header
LB: loop body
LE: loop exit
PB: predicated region body
PF: predicated region fallthrough
CT: control target
= control target key end

     0   :  { %16 = vsyncpa [#allocation5], 0  ;;  %s1186_s0 = inlined_call_operand.hbm [shape: f32[16,128], index: 0, kind: input, shape index: {}]   ;;  %s1187_s1 = inlined_call_operand.hbm [shape: f32[128,128], index: 1, kind: input, shape index: {}]   ;;  %s1188_s2 = inlined_call_operand.vmem [shape: f32[1,128], index: 2, kind: input, shape index: {}]   ;;  %s1189_s3 = inlined_call_operand.hbm [shape: bf16[128,128], index: 3, kind: input, shape index: {}]   ;;  %s1190_s4 = inlined_call_operand.hbm [shape: bf16[128,128], index: 4, kind: input, shape index: {}]   ;;  %s1191_s5 = inlined_call_operand.hbm [shape: f32[128,128], index: 5, kind: input, shape index: {}]   ;;  %s1192_s6 = inlined_call_operand.vmem [shape: f32[1,128], index: 6, kind: input, shape index: {}]   ;;  %s1193_s7 = inlined_call_operand.vmem [shape: f32[1,128], index: 7, kind: input, shape index: {}]   ;;  %s1194_s8 = inlined_call_operand.hbm [shape: f32[16,128], index: 8, kind: output, shape index: {0}]   ;;  %s1195_s9 = inlined_call_operand.hbm [shape: f32[16,128], index: 9, kind: output, shape index: {1}]   ;;  %s1196_s10 = inlined_call_operand.hbm [shape: bf16[16,128], index: 10, kind: output, shape index: {2}]  }
   0x1   :  { %17 = vsyncpa [#allocation8], 0 }
   0x2   :  { %18 = vsyncpa [#allocation11], 0 }
   0x3   :  { %19 = vsyncpa [#allocation6], 0 }
   0x4   :  { %20 = vsyncpa [#allocation15], 0  ;;  %s1060_s13 = smov [#allocation7]  }
   0x5   :  { %s38_s14 = sshll.u32 %s1060_s13, 4  ;;  %s39_s14 = int_to_ptr.vmem [resolvable:$true] %s38_s14 }
   0x6   :  { %s898_s15 = scalar_lea.vmem %s39_s14, 2048  ;;  %p903_p1 = scmp.lt.s32.totalorder %s39_s14, %s39_s14 }
   0x7   :  { %p899_p0 = scmp.ne.s32.totalorder %s39_s14, %s898_s15  ;;  %p904_p2 = scmp.lt.s32.totalorder %s898_s15, %s898_s15 }
   0x9   :  { %p905_p3 = por %p904_p2, %p903_p1 }
   0xb   :  { %p906_p4 = pnand %p905_p3, %p899_p0 }
   0xd   :  { %909 = shalt.err (!%p906_p4)
}
   0xe   :  { %s1061_s16 = smov 128   ;;  %s1062_s17 = smov 8  }
   0xf   :  { %44 = dma.hbm_to_vmem [thread:$0]  %s1187_s1, 2048, %s39_s14, [#allocation8], %s1061_s16, %s1061_s16, %s1062_s17  }
  0x10   :  { %s1063_s20 = smov [#allocation10]   ;;  %s1064_s22 = smov [#allocation4]  }
  0x11   :  { %s64_s21 = sshll.u32 %s1063_s20, 4  ;;  %s26_s23 = sshll.u32 %s1064_s22, 4  ;;  %s65_s21 = int_to_ptr.vmem [resolvable:$true] %s64_s21  ;;  %s27_s23 = int_to_ptr.vmem [resolvable:$true] %s26_s23 }
  0x12   :  { %s918_s24 = scalar_lea.vmem %s65_s21, 1024  ;;  %p923_p6 = scmp.lt.s32.totalorder %s65_s21, %s65_s21 }
  0x13   :  { %p919_p5 = scmp.ne.s32.totalorder %s65_s21, %s918_s24  ;;  %p924_p7 = scmp.lt.s32.totalorder %s918_s24, %s918_s24 }
  0x15   :  { %p925_p8 = por %p924_p7, %p923_p6 }
  0x17   :  { %p926_p9 = pnand %p925_p8, %p919_p5 }
  0x19   :  { %929 = shalt.err (!%p926_p9)
}
  0x1a   :  { %s1065_s25 = smov 64   ;;  %s1066_s26 = smov 4  }
  0x1b   :  { %70 = dma.hbm_to_vmem [thread:$0]  %s1190_s4, 1024, %s65_s21, [#allocation11], %s1065_s25, %s1065_s25, %s1066_s26  }
  0x1c   :  { %s938_s1 = scalar_lea.vmem %s27_s23, 256  ;;  %p943_p11 = scmp.lt.s32.totalorder %s27_s23, %s27_s23 }
  0x1d   :  { %p939_p10 = scmp.ne.s32.totalorder %s27_s23, %s938_s1  ;;  %p944_p12 = scmp.lt.s32.totalorder %s938_s1, %s938_s1 }
  0x1f   :  { %p945_p13 = por %p944_p12, %p943_p11 }
  0x21   :  { %p946_p0 = pnand %p945_p13, %p939_p10 }
  0x23   :  { %949 = shalt.err (!%p946_p0)
}
  0x24   :  { %32 = dma.hbm_to_vmem [thread:$0]  %s1186_s0, 256, %s27_s23, [#allocation5], %s1061_s16, %s1061_s16, %s1062_s17  }
  0x25   :  { %s1067_s11 = smov [#allocation9]   ;;  %s1068_s13 = smov [#allocation12]  }
  0x26   :  { %s52_s12 = sshll.u32 %s1067_s11, 4  ;;  %s76_s4 = sshll.u32 %s1068_s13, 4  ;;  %s53_s12 = int_to_ptr.vmem [resolvable:$true] %s52_s12  ;;  %s77_s4 = int_to_ptr.vmem [resolvable:$true] %s76_s4 }
  0x27   :  { %s958_s14 = scalar_lea.vmem %s53_s12, 1024  ;;  %p963_p2 = scmp.lt.s32.totalorder %s53_s12, %s53_s12 }
  0x28   :  { %p959_p1 = scmp.ne.s32.totalorder %s53_s12, %s958_s14  ;;  %p964_p3 = scmp.lt.s32.totalorder %s958_s14, %s958_s14 }
  0x2a   :  { %p965_p4 = por %p964_p3, %p963_p2 }
  0x2c   :  { %p966_p5 = pnand %p965_p4, %p959_p1 }
  0x2e   :  { %969 = shalt.err (!%p966_p5)
}
  0x2f   :  { %58 = dma.hbm_to_vmem [thread:$0]  %s1189_s3, 1024, %s53_s12, [#allocation8], %s1065_s25, %s1065_s25, %s1066_s26  }
  0x30   :  { %s978_s0 = scalar_lea.vmem %s77_s4, 2048  ;;  %p983_p7 = scmp.lt.s32.totalorder %s77_s4, %s77_s4 }
  0x31   :  { %p979_p6 = scmp.ne.s32.totalorder %s77_s4, %s978_s0  ;;  %p984_p8 = scmp.lt.s32.totalorder %s978_s0, %s978_s0 }
  0x33   :  { %p985_p9 = por %p984_p8, %p983_p7 }
  0x35   :  { %p986_p10 = pnand %p985_p9, %p979_p6 }
  0x37   :  { %989 = shalt.err (!%p986_p10)
}
  0x38   :  { %82 = dma.hbm_to_vmem [thread:$0]  %s1191_s5, 2048, %s77_s4, [#allocation11], %s1061_s16, %s1061_s16, %s1062_s17  }
  0x39   :  { %1050 = dma.done.wait [#allocation5], 256  }
  0x3a   :  { %1051 = vsyncadd [#allocation5], 4294967040 }
  0x3b   :  { %1052 = dma.done.wait [#allocation8], 3072  }
  0x3c   :  { %1053 = vsyncadd [#allocation8], 4294964224 }
  0x3d   :  { %1054 = dma.done.wait [#allocation11], 3072  }
  0x3e   :  { %1055 = vsyncadd [#allocation11], 4294964224  ;;  %v124_v0 = vld [vmem:[#allocation7 + $0x78] sm:$0xff]  ;;  %v123_v1 = vld [vmem:[#allocation7 + $0x70] sm:$0xff]  ;;  %v1069_v26 = vmov 0.0   ;;  %vm1070_vm0 = vmmov 0  }
  0x3f   :  { %741 = vmatprep.subr.mxu0 %v124_v0  ;;  %v122_v2 = vld [vmem:[#allocation7 + $0x68] sm:$0xff]  ;;  %v121_v3 = vld [vmem:[#allocation7 + $0x60] sm:$0xff]  ;;  %v120_v4 = vld [vmem:[#allocation7 + $0x58] sm:$0xff]  ;;  %776 = vmatprep.subr.bf16.mxu1 %v1069_v26 }
  0x40   :  { %742 = vmatpush3.msra.mxu0 %v124_v0  ;;  %v107_v5 = vld [vmem:[#allocation4] sm:$0xff]  ;;  %v118_v7 = vld [vmem:[#allocation7 + $0x48] sm:$0xff]  ;;  %v117_v8 = vld [vmem:[#allocation7 + $0x40] sm:$0xff]  ;;  %792 = vmatprep.mubr.msk.bf16.mxu1 %vm1070_vm0, %v1069_v26 }
  0x41   :  { %743 = vmatprep.subr.mxu0 %v123_v1  ;;  %v119_v6 = vld [vmem:[#allocation7 + $0x50] sm:$0xff]  ;;  %773 = vmatprep.mubr.f32.mxu0 %v107_v5  ;;  %v116_v9 = vld [vmem:[#allocation7 + $0x38] sm:$0xff]  ;;  %v114_v11 = vld [vmem:[#allocation7 + $0x28] sm:$0xff] }
  0x42   :  { %744 = vmatpush3.msra.mxu0 %v123_v1  ;;  %v115_v10 = vld [vmem:[#allocation7 + $0x30] sm:$0xff]  ;;  %v113_v12 = vld [vmem:[#allocation7 + $0x20] sm:$0xff]  ;;  %v112_v13 = vld [vmem:[#allocation7 + $0x18] sm:$0xff] }
  0x43   :  { %745 = vmatprep.subr.mxu0 %v122_v2  ;;  %v111_v14 = vld [vmem:[#allocation7 + $0x10] sm:$0xff]  ;;  %v110_v15 = vld [vmem:[#allocation7 + $0x8] sm:$0xff]  ;;  %v109_v16 = vld [vmem:[#allocation7] sm:$0xff] }
  0x44   :  { %746 = vmatpush3.msra.mxu0 %v122_v2  ;;  %v108_v17 = vld [vmem:[#allocation4 + $0x8] sm:$0xff]  ;;  %v649_v19 = vld [vmem:[%s1188_s2] ss:$0 sm:$0xff]  ;;  %v866_v27 = vld [vmem:[#allocation9 + $0x30] sm:$0xff]   ;;  %s1071_s2 = smov [#allocation13]  }
  0x45   :  { %747 = vmatprep.subr.mxu0 %v121_v3  ;;  %v865_v25 = vld [vmem:[#allocation9 + $0x38] sm:$0xff]   ;;  %v867_v28 = vld [vmem:[#allocation9 + $0x28] sm:$0xff]   ;;  %v868_v29 = vld [vmem:[#allocation9 + $0x20] sm:$0xff]   ;;  %s604_s21 = sshll.u32 %s1071_s2, 4  ;;  %s605_s21 = int_to_ptr.vmem [resolvable:$true] %s604_s21 }
  0x46   :  { %748 = vmatpush3.msra.mxu0 %v121_v3  ;;  %777 = vmatpush3.bf16.msra.mxu1 %v865_v25  ;;  %v869_v30 = vld [vmem:[#allocation9 + $0x18] sm:$0xff]   ;;  %v870_v31 = vld [vmem:[#allocation9 + $0x10] sm:$0xff]   ;;  %v871_v32 = vld [vmem:[#allocation9 + $0x8] sm:$0xff]   ;;  %s990_s22 = scalar_lea.vmem %s605_s21, 256  ;;  %p995_p12 = scmp.lt.s32.totalorder %s605_s21, %s605_s21 }
  0x47   :  { %749 = vmatprep.subr.mxu0 %v120_v4  ;;  %778 = vmatprep.subr.bf16.mxu1 %v1069_v26  ;;  %v872_v33 = vld [vmem:[#allocation9] sm:$0xff]   ;;  %v874_v34 = vld [vmem:[#allocation10 + $0x38] sm:$0xff]   ;;  %v875_v35 = vld [vmem:[#allocation10 + $0x30] sm:$0xff]   ;;  %p991_p11 = scmp.ne.s32.totalorder %s605_s21, %s990_s22  ;;  %p996_p13 = scmp.lt.s32.totalorder %s990_s22, %s990_s22 }
  0x48   :  { %750 = vmatpush3.msra.mxu0 %v120_v4  ;;  %v876_v36 = vld [vmem:[#allocation10 + $0x28] sm:$0xff]   ;;  %v877_v37 = vld [vmem:[#allocation10 + $0x20] sm:$0xff]   ;;  %v878_v38 = vld [vmem:[#allocation10 + $0x18] sm:$0xff]  }
  0x49   :  { %751 = vmatprep.subr.mxu0 %v119_v6  ;;  %v879_v49 = vld [vmem:[#allocation10 + $0x10] sm:$0xff]   ;;  %v880_v50 = vld [vmem:[#allocation10 + $0x8] sm:$0xff]   ;;  %v881_v51 = vld [vmem:[#allocation10] sm:$0xff]   ;;  %p997_p0 = por %p996_p13, %p995_p12 }
  0x4a   :  { %752 = vmatpush3.msra.mxu0 %v119_v6  ;;  %779 = vmatpush3.bf16.msra.mxu1 %v866_v27  ;;  %v501_v61 = vld [vmem:[#allocation12 + $0x78] sm:$0xff]  ;;  %v500_v62 = vld [vmem:[#allocation12 + $0x70] sm:$0xff]  ;;  %v499_v63 = vld [vmem:[#allocation12 + $0x68] sm:$0xff] }
  0x4b   :  { %753 = vmatprep.subr.mxu0 %v118_v7  ;;  %780 = vmatprep.subr.bf16.mxu1 %v1069_v26  ;;  %v498_v0 = vld [vmem:[#allocation12 + $0x60] sm:$0xff]  ;;  %v497_v1 = vld [vmem:[#allocation12 + $0x58] sm:$0xff]  ;;  %p998_p1 = pnand %p997_p0, %p991_p11 }
  0x4c   :  { %754 = vmatpush3.msra.mxu0 %v118_v7 }
  0x4d   :  { %755 = vmatprep.subr.mxu0 %v117_v8 }
  0x4e   :  { %756 = vmatpush3.msra.mxu0 %v117_v8  ;;  %781 = vmatpush3.bf16.msra.mxu1 %v867_v28  ;;  %v496_v8 = vld [vmem:[#allocation12 + $0x50] sm:$0xff] }
  0x4f   :  { %757 = vmatprep.subr.mxu0 %v116_v9  ;;  %782 = vmatprep.subr.bf16.mxu1 %v1069_v26 }
  0x50   :  { %758 = vmatpush3.msra.mxu0 %v116_v9  ;;  %v495_v9 = vld [vmem:[#allocation12 + $0x48] sm:$0xff] }
  0x51   :  { %759 = vmatprep.subr.mxu0 %v115_v10 }
  0x52   :  { %760 = vmatpush3.msra.mxu0 %v115_v10  ;;  %783 = vmatpush3.bf16.msra.mxu1 %v868_v29  ;;  %v494_v10 = vld [vmem:[#allocation12 + $0x40] sm:$0xff] }
  0x53   :  { %761 = vmatprep.subr.mxu0 %v114_v11  ;;  %784 = vmatprep.subr.bf16.mxu1 %v1069_v26 }
  0x54   :  { %762 = vmatpush3.msra.mxu0 %v114_v11  ;;  %v493_v11 = vld [vmem:[#allocation12 + $0x38] sm:$0xff] }
  0x55   :  { %763 = vmatprep.subr.mxu0 %v113_v12 }
  0x56   :  { %764 = vmatpush3.msra.mxu0 %v113_v12  ;;  %785 = vmatpush3.bf16.msra.mxu1 %v869_v30  ;;  %v492_v12 = vld [vmem:[#allocation12 + $0x30] sm:$0xff] }
  0x57   :  { %765 = vmatprep.subr.mxu0 %v112_v13  ;;  %786 = vmatprep.subr.bf16.mxu1 %v1069_v26 }
  0x58   :  { %766 = vmatpush3.msra.mxu0 %v112_v13  ;;  %v491_v13 = vld [vmem:[#allocation12 + $0x28] sm:$0xff] }
  0x59   :  { %767 = vmatprep.subr.mxu0 %v111_v14 }
  0x5a   :  { %768 = vmatpush3.msra.mxu0 %v111_v14  ;;  %787 = vmatpush3.bf16.msra.mxu1 %v870_v31  ;;  %v490_v14 = vld [vmem:[#allocation12 + $0x20] sm:$0xff] }
  0x5b   :  { %769 = vmatprep.subr.mxu0 %v110_v15  ;;  %788 = vmatprep.subr.bf16.mxu1 %v1069_v26 }
  0x5c   :  { %770 = vmatpush3.msra.mxu0 %v110_v15  ;;  %v489_v15 = vld [vmem:[#allocation12 + $0x18] sm:$0xff] }
  0x5d   :  { %771 = vmatprep.subr.mxu0 %v109_v16 }
  0x5e   :  { %772 = vmatpush3.msra.mxu0 %v109_v16  ;;  %789 = vmatpush3.bf16.msra.mxu1 %v871_v32  ;;  %v488_v16 = vld [vmem:[#allocation12 + $0x10] sm:$0xff] }
  0x5f   :  { %774 = vmatmul.mubr.f32.vlgmr.msra.gmra.mxu0 %v108_v17  ;;  %796 = vmatprep.subr.bf16.mxu0 %v1069_v26  ;;  %v487_v17 = vld [vmem:[#allocation12 + $0x8] sm:$0xff] }
  0x60   :  { %812 = vmatprep.mubr.msk.bf16.mxu0 %vm1070_vm0, %v1069_v26  ;;  %790 = vmatprep.subr.bf16.mxu1 %v1069_v26 }
  0x61   :  { %797 = vmatpush3.bf16.msra.mxu0 %v874_v34 }
  0x62   :  { %791 = vmatpush3.bf16.msra.mxu1 %v872_v33  ;;  %798 = vmatprep.subr.bf16.mxu0 %v1069_v26 }
  0x63   :  { %816 = vmatprep.subr.mxu1 %v501_v61 }
  0x65   :  { %799 = vmatpush3.bf16.msra.mxu0 %v875_v35 }
  0x66   :  { %800 = vmatprep.subr.bf16.mxu0 %v1069_v26 }
  0x69   :  { %801 = vmatpush3.bf16.msra.mxu0 %v876_v36 }
  0x6a   :  { %802 = vmatprep.subr.bf16.mxu0 %v1069_v26 }
  0x6d   :  { %803 = vmatpush3.bf16.msra.mxu0 %v877_v37 }
  0x6e   :  { %804 = vmatprep.subr.bf16.mxu0 %v1069_v26 }
  0x71   :  { %805 = vmatpush3.bf16.msra.mxu0 %v878_v38 }
  0x72   :  { %806 = vmatprep.subr.bf16.mxu0 %v1069_v26 }
  0x75   :  { %807 = vmatpush3.bf16.msra.mxu0 %v879_v49 }
  0x76   :  { %808 = vmatprep.subr.bf16.mxu0 %v1069_v26 }
  0x79   :  { %809 = vmatpush3.bf16.msra.mxu0 %v880_v50 }
  0x7a   :  { %810 = vmatprep.subr.bf16.mxu0 %v1069_v26 }
  0x7d   :  { %811 = vmatpush3.bf16.msra.mxu0 %v881_v51 }
 0x11f   :  { %v775_v18 = vpop.f32.mrf.mxu0 }
 0x120   :  { %v204_v22 = vadd.f32 %v775_v18, %v649_v19  ;;  %v486_v18 = vld [vmem:[#allocation12] sm:$0xff] }
 0x121   :  { %v198_v20 = vpop.f32.mrf.mxu0 }
 0x122   :  { %v199_v21 = vadd.f32 %v649_v19, %v198_v20  ;;  %v208_v24 = vmul.f32 %v204_v22, %v204_v22 }
 0x124   :  { %v207_v23 = vmul.f32 %v199_v21, %v199_v21 }
 0x126   :  { %209 = vadd.xlane.f32.xlu0 %v207_v23 }
 0x12a   :  { %211 = vadd.xlane.f32.xlu0 %v208_v24 }
 0x1af   :  { %v210_v39 = vpop.xlane.xlu0 %209 }
 0x1b0   :  { %v213_v40 = vmax.f32 %v210_v39, 1e-24 }
 0x1b2   :  { %882 = vrsqrt.f32 %v213_v40 }
 0x1b3   :  { %v212_v41 = vpop.xlane.xlu0 %211 }
 0x1b4   :  { %v214_v42 = vmax.f32 %v212_v41, 1e-24 }
 0x1b6   :  { %884 = vrsqrt.f32 %v214_v42 }
 0x1bf   :  { %v883_v43 = vpop.eup %882 }
 0x1c0   :  { %v217_v45 = vmul.f32 %v883_v43, %v199_v21 }
 0x1c3   :  { %v885_v44 = vpop.eup %884 }
 0x1c4   :  { %v218_v46 = vmul.f32 %v885_v44, %v204_v22 }
 0x1c6   :  { %v680_v47 = vpack.c.bf16 %v218_v46, %v217_v45 }
 0x1c8   :  { %681 = vst [vmem:[#allocation2] sm:$0xff] %v680_v47  }
 0x1cf   :  { %v873_v48 = vld [vmem:[#allocation2] sm:$0xff]  }
 0x1d0   :  { %793 = vmatmul.mubr.bf16.vlgmr.msra.gmra.mxu1 %v873_v48 }
 0x1d1   :  { %817 = vmatpush3.msra.mxu1 %v501_v61 }
 0x1d2   :  { %818 = vmatprep.subr.mxu1 %v500_v62 }
 0x1d3   :  { %819 = vmatpush3.msra.mxu1 %v500_v62 }
 0x1d4   :  { %820 = vmatprep.subr.mxu1 %v499_v63 }
 0x1d5   :  { %821 = vmatpush3.msra.mxu1 %v499_v63 }
 0x1d6   :  { %822 = vmatprep.subr.mxu1 %v498_v0 }
 0x1d7   :  { %823 = vmatpush3.msra.mxu1 %v498_v0 }
 0x1d8   :  { %824 = vmatprep.subr.mxu1 %v497_v1 }
 0x1d9   :  { %825 = vmatpush3.msra.mxu1 %v497_v1 }
 0x1da   :  { %826 = vmatprep.subr.mxu1 %v496_v8 }
 0x1db   :  { %827 = vmatpush3.msra.mxu1 %v496_v8 }
 0x1dc   :  { %828 = vmatprep.subr.mxu1 %v495_v9 }
 0x1dd   :  { %829 = vmatpush3.msra.mxu1 %v495_v9 }
 0x1de   :  { %830 = vmatprep.subr.mxu1 %v494_v10 }
 0x1df   :  { %831 = vmatpush3.msra.mxu1 %v494_v10 }
 0x1e0   :  { %832 = vmatprep.subr.mxu1 %v493_v11 }
 0x1e1   :  { %833 = vmatpush3.msra.mxu1 %v493_v11 }
 0x1e2   :  { %834 = vmatprep.subr.mxu1 %v492_v12 }
 0x1e3   :  { %835 = vmatpush3.msra.mxu1 %v492_v12 }
 0x1e4   :  { %836 = vmatprep.subr.mxu1 %v491_v13 }
 0x1e5   :  { %837 = vmatpush3.msra.mxu1 %v491_v13 }
 0x1e6   :  { %838 = vmatprep.subr.mxu1 %v490_v14 }
 0x1e7   :  { %839 = vmatpush3.msra.mxu1 %v490_v14 }
 0x1e8   :  { %840 = vmatprep.subr.mxu1 %v489_v15 }
 0x1e9   :  { %841 = vmatpush3.msra.mxu1 %v489_v15 }
 0x1ea   :  { %842 = vmatprep.subr.mxu1 %v488_v16 }
 0x1eb   :  { %843 = vmatpush3.msra.mxu1 %v488_v16 }
 0x1ec   :  { %844 = vmatprep.subr.mxu1 %v487_v17 }
 0x1ed   :  { %845 = vmatpush3.msra.mxu1 %v487_v17 }
 0x1ee   :  { %846 = vmatprep.subr.mxu1 %v486_v18 }
 0x1ef   :  { %847 = vmatpush3.msra.mxu1 %v486_v18 }
 0x290   :  { %v337_v52 = vpop.f32.mrf.mxu1 }
 0x291   :  { %v344_v54 = vmul.f32 %v337_v52, %v337_v52 }
 0x292   :  { %v794_v53 = vpop.f32.mrf.mxu1 }
 0x293   :  { %v346_v58 = vmul.f32 %v344_v54, %v337_v52 }
 0x294   :  { %v340_v55 = vpop.f32.mrf.mxu1 }
 0x295   :  { %v345_v56 = vmul.f32 %v340_v55, %v340_v55 }
 0x296   :  { %v795_v57 = vpop.f32.mrf.mxu1 }
 0x297   :  { %v347_v59 = vmul.f32 %v345_v56, %v340_v55 }
 0x299   :  { %v348_v60 = vpack.c.bf16 %v347_v59, %v346_v58 }
 0x29b   :  { %686 = vst [vmem:[#allocation16] sm:$0xff] %v348_v60   ;;  %813 = vmatmul.mubr.bf16.vlgmr.msra.gmra.mxu0 %v348_v60 }
 0x35b   :  { %v458_v2 = vpop.f32.mrf.mxu0 }
 0x35c   :  { %597 = vst [vmem:[#allocation13] sm:$0xff] %v458_v2  ;;  %v474_v3 = vmul.f32 %v458_v2, %v458_v2 }
 0x35d   :  { %v814_v4 = vpop.f32.mrf.mxu0 }
 0x35e   :  { %476 = vadd.xlane.f32.xlu1 %v474_v3 }
 0x35f   :  { %v461_v5 = vpop.f32.mrf.mxu0 }
 0x360   :  { %598 = vst [vmem:[#allocation13 + $0x8] sm:$0xff] %v461_v5  ;;  %v475_v6 = vmul.f32 %v461_v5, %v461_v5 }
 0x361   :  { %v815_v7 = vpop.f32.mrf.mxu0 }
 0x362   :  { %478 = vadd.xlane.f32.xlu1 %v475_v6 }
 0x3e7   :  { %v477_v19 = vpop.xlane.xlu1 %476 }
 0x3e8   :  { %v480_v20 = vmax.f32 %v477_v19, 1e-24 }
 0x3ea   :  { %886 = vrsqrt.f32 %v480_v20 }
 0x3eb   :  { %v479_v21 = vpop.xlane.xlu1 %478 }
 0x3ec   :  { %v481_v22 = vmax.f32 %v479_v21, 1e-24 }
 0x3ee   :  { %888 = vrsqrt.f32 %v481_v22 }
 0x3f7   :  { %v887_v23 = vpop.eup %886 }
 0x3f8   :  { %v484_v24 = vmul.f32 %v887_v23, %v458_v2 }
 0x3fa   :  { %848 = vmatprep.mubr.f32.mxu1 %v484_v24 }
 0x3fb   :  { %v889_v25 = vpop.eup %888 }
 0x3fc   :  { %v485_v26 = vmul.f32 %v889_v25, %v461_v5 }
 0x3fe   :  { %849 = vmatmul.mubr.f32.vlgmr.msra.gmra.mxu1 %v485_v26 }
 0x3ff   :  { %1001 = shalt.err (!%p998_p1)
}
 0x400   :  { %610 = dma.vmem_to_hbm [thread:$0]  %s605_s21, 256, %s1194_s8, [#allocation6], %s1061_s16, %s1061_s16, %s1062_s17  }
 0x401   :  { %v671_v27 = vld [vmem:[%s1192_s6] ss:$0 sm:$0xff]  ;;  %s1072_s30 = smov [#allocation14]   ;;  %s1073_s12 = smov [#allocation16]  }
 0x402   :  { %v672_v29 = vld [vmem:[%s1193_s7] ss:$0 sm:$0xff]  ;;  %s616_s11 = sshll.u32 %s1072_s30, 4  ;;  %s628_s13 = sshll.u32 %s1073_s12, 4  ;;  %s617_s11 = int_to_ptr.vmem [resolvable:$true] %s616_s11  ;;  %s629_s13 = int_to_ptr.vmem [resolvable:$true] %s628_s13 }
 0x403   :  { %s1010_s8 = scalar_lea.vmem %s617_s11, 256  ;;  %p1015_p3 = scmp.lt.s32.totalorder %s617_s11, %s617_s11 }
 0x404   :  { %p1011_p2 = scmp.ne.s32.totalorder %s617_s11, %s1010_s8  ;;  %p1016_p4 = scmp.lt.s32.totalorder %s1010_s8, %s1010_s8 }
 0x406   :  { %p1017_p5 = por %p1016_p4, %p1015_p3 }
 0x408   :  { %p1018_p6 = pnand %p1017_p5, %p1011_p2 }
 0x4be   :  { %v850_v28 = vpop.f32.mrf.mxu1 }
 0x4bf   :  { %v585_v30 = vmul.f32 %v850_v28, %v671_v27 }
 0x4c0   :  { %v568_v31 = vpop.f32.mrf.mxu1 }
 0x4c1   :  { %v594_v32 = vsub.f32 %v585_v30, %v672_v29  ;;  %v584_v33 = vmul.f32 %v671_v27, %v568_v31 }
 0x4c3   :  { %596 = vst [vmem:[#allocation14 + $0x8] sm:$0xff] %v594_v32  ;;  %v593_v34 = vsub.f32 %v584_v33, %v672_v29 }
 0x4c5   :  { %595 = vst [vmem:[#allocation14] sm:$0xff] %v593_v34 }
 0x4c6   :  { %1021 = shalt.err (!%p1018_p6)
}
 0x4c7   :  { %622 = dma.vmem_to_hbm [thread:$0]  %s617_s11, 256, %s1195_s9, [#allocation15], %s1061_s16, %s1061_s16, %s1062_s17  }
 0x4c8   :  { %s1030_s4 = scalar_lea.vmem %s629_s13, 128  ;;  %p1035_p8 = scmp.lt.s32.totalorder %s629_s13, %s629_s13 }
 0x4c9   :  { %p1031_p7 = scmp.ne.s32.totalorder %s629_s13, %s1030_s4  ;;  %p1036_p9 = scmp.lt.s32.totalorder %s1030_s4, %s1030_s4 }
 0x4cb   :  { %p1037_p10 = por %p1036_p9, %p1035_p8 }
 0x4cd   :  { %p1038_p11 = pnand %p1037_p10, %p1031_p7 }
 0x4cf   :  { %1041 = shalt.err (!%p1038_p11)
}
 0x4d0   :  { %634 = dma.vmem_to_hbm [thread:$0]  %s629_s13, 128, %s1196_s10, [#allocation15], %s1065_s25, %s1065_s25, %s1066_s26  }
 0x4d1   :  { %1056 = dma.done.wait [#allocation6], 256  }
 0x4d2   :  { %1057 = vsyncadd [#allocation6], 4294967040 }
 0x4d3   :  { %1058 = dma.done.wait [#allocation15], 384  }
 0x4d4   :  { %1059 = vsyncadd [#allocation15], 4294966912 }
 0x4d5   :  { %644 = vsyncpa [#allocation5], 1 }
 0x4d6   :  { %645 = vsyncpa [#allocation8], 1 }
 0x4d7   :  { %646 = vsyncpa [#allocation11], 1 }
 0x4d8   :  { %647 = vsyncpa [#allocation6], 1 }
 0x4d9   :  { %648 = vsyncpa [#allocation15], 1 }

</bundles_post_ra>
